<compile_context>
chip_gen: v5e
topology: v5e:2x2
jax: 0.10.0
libtpu: 0.0.40
codegen_flags: <defaults>
</compile_context>

<pallas_src>
import math

import jax
import jax.numpy as jnp
from jax.experimental import pallas as pl
from jax.experimental.pallas import tpu as pltpu


_BLOCK_BYTE_CAP = 4 * 1024 * 1024      # per-block VMEM budget (~4 MiB)
_MAX_LANE_TILE = 16384                 # elements; leaves room for a tall sublane tile
_MAX_VIEW_COLS = 8192                  # target row width of the lane-dense 2-D view
_VMEM_LIMIT_BYTES = 32 * 1024 * 1024   # 2 bufs x (in + out) x 4 MiB = 16 MiB, 2x headroom


def _copy_kernel(x_ref, o_ref):
    # Plain lane-dense 2-D identity copy: pure full-width vld/vst.
    o_ref[...] = x_ref[...]


def _lane_dense_cols(total):
    """Largest multiple-of-128 divisor of `total` that is <= _MAX_VIEW_COLS, or None."""
    if total % 128 != 0:
        return None
    c = min(total, _MAX_VIEW_COLS)
    c -= c % 128
    while c >= 128:
        if total % c == 0:
            return c
        c -= 128
    return None  # unreachable when total % 128 == 0


def _pallas_copy_2d(x2):
    """Identity-copy an (N, F) array through a Pallas kernel with lane-dense tiling."""
    n, f = x2.shape
    itemsize = jnp.dtype(x2.dtype).itemsize
    block_elems = max(128, _BLOCK_BYTE_CAP // itemsize)
    sub_unit = max(8, 32 // itemsize)  # f32 -> 8, bf16 -> 16, int8/fp8 -> 32

    # Lane (last-dim) tile: full extent if small, else the largest multiple of
    # 128 under the cap.  pl.cdiv covers the ragged edge block (Pallas pads it).
    if f <= 128:
        tf = f
    else:
        tf = (min(f, _MAX_LANE_TILE) // 128) * 128

    # Sublane (row) tile: full extent if small, else a multiple of sub_unit
    # chosen so the block stays within the byte cap (at least one sub_unit tall).
    if n <= sub_unit:
        tn = n
    else:
        max_rows = max(sub_unit, block_elems // tf)
        tn = (min(n, max_rows) // sub_unit) * sub_unit

    grid = (pl.cdiv(n, tn), pl.cdiv(f, tf))

    return pl.pallas_call(
        _copy_kernel,
        out_shape=jax.ShapeDtypeStruct((n, f), x2.dtype),
        grid=grid,
        in_specs=[pl.BlockSpec((tn, tf), lambda i, j: (i, j))],
        out_specs=pl.BlockSpec((tn, tf), lambda i, j: (i, j)),
        compiler_params=pltpu.CompilerParams(
            dimension_semantics=("parallel", "parallel"),
            vmem_limit_bytes=_VMEM_LIMIT_BYTES,
        ),
        cost_estimate=pl.CostEstimate(
            flops=0,
            transcendentals=0,
            bytes_accessed=2 * n * f * itemsize,
        ),
    )(x2)


def flatten(x, start_dim=1, end_dim=-1):
    """Pallas-backed equivalent of torch.nn.Flatten(start_dim, end_dim).forward."""
    ndim = max(x.ndim, 1)
    sd = start_dim + ndim if start_dim < 0 else start_dim
    ed = end_dim + ndim if end_dim < 0 else end_dim
    if not (0 <= sd < ndim and 0 <= ed < ndim):
        raise ValueError("flatten: dimension out of range")
    if sd > ed:
        raise ValueError("flatten: start_dim cannot come after end_dim")

    shape = x.shape if x.ndim > 0 else (1,)
    out_shape = shape[:sd] + (math.prod(shape[sd:ed + 1]),) + shape[ed + 1:]

    if x.size == 0:
        return jnp.reshape(x, out_shape)

    # Present the data to the kernel as a lane-dense 2-D slab (free reshape),
    # run the identity-copy kernel, then reshape back (also free, order-preserving).
    total = x.size
    cols = _lane_dense_cols(total)
    if cols is not None:
        view = (total // cols, cols)
    elif x.ndim >= 2:
        view = (total // x.shape[-1], x.shape[-1])
    else:
        view = (1, total)

    copied = _pallas_copy_2d(jnp.reshape(x, view))
    return jnp.reshape(copied, out_shape)


if __name__ == "__main__":
    key = jax.random.PRNGKey(0)
    # Small NCHW input consistent with a conv-style feature map.
    x = jax.random.normal(key, (2, 4, 16, 16), dtype=jnp.float32)

    out = flatten(x, start_dim=1, end_dim=-1)
    out = jax.block_until_ready(out)

    # Verify against the pure-JAX reference (torch Flatten semantics).
    ref = jnp.reshape(x, (2, 4 * 16 * 16))
    assert out.shape == (2, 1024), out.shape
    assert out.dtype == x.dtype, out.dtype
    assert jnp.array_equal(out, ref), "Flatten kernel mismatch"

    print("KERNEL_OK")
</pallas_src>

<mosaic_0001>
module attributes {stable_mosaic.version = 11 : i64} {
  func.func @_copy_kernel(%arg0: i32, %arg1: i32, %arg2: memref<1x2048xf32, #tpu.memory_space<vmem>>, %arg3: memref<1x2048xf32, #tpu.memory_space<vmem>>) attributes {dimension_semantics = [#tpu.dimension_semantics<parallel>, #tpu.dimension_semantics<parallel>], iteration_bounds = array<i64: 1, 1>, scalar_prefetch = 0 : i64, scratch_operands = 0 : i64, tpu.core_type = #tpu.core_type<tc>, window_params = [{transform_indices = @transform_0, window_bounds = array<i64: 1, 2048>}, {transform_indices = @transform_1, window_bounds = array<i64: 1, 2048>}]} {
    %c0 = arith.constant 0 : index
    %c0_0 = arith.constant 0 : index
    %0 = vector.load %arg2[%c0, %c0_0] : memref<1x2048xf32, #tpu.memory_space<vmem>>, vector<1x2048xf32>
    %c0_1 = arith.constant 0 : index
    %c0_2 = arith.constant 0 : index
    %1 = vector.load %arg3[%c0_1, %c0_2] : memref<1x2048xf32, #tpu.memory_space<vmem>>, vector<1x2048xf32>
    tpu.vector_store %arg3[%c0_1, %c0_2], %0 {strides = array<i32>} : memref<1x2048xf32, #tpu.memory_space<vmem>>, vector<1x2048xf32>,
    return
  }
  func.func @transform_0(%arg0: i32, %arg1: i32) -> (i32, i32) {
    %c0_i32 = arith.constant 0 : i32
    return %arg0, %arg1 : i32, i32
  }
  func.func @transform_1(%arg0: i32, %arg1: i32) -> (i32, i32) {
    %c0_i32 = arith.constant 0 : i32
    return %arg0, %arg1 : i32, i32
  }
}

</mosaic_0001>

<bundles_post_ra>
// kernel: tpu_custom_call.1
= control target key start
LH: loop header
LB: loop body
LE: loop exit
PB: predicated region body
PF: predicated region fallthrough
CT: control target
= control target key end

     0   :  { %6 = vsyncpa [#allocation3], 0  ;;  %s116_s0 = inlined_call_operand.hbm [shape: f32[1,2048], index: 0, kind: input, shape index: {}]   ;;  %s117_s1 = inlined_call_operand.hbm [shape: f32[1,2048], index: 1, kind: output, shape index: {}]  }
   0x1   :  { %7 = vsyncpa [#allocation4], 0  ;;  %s13_s8 = sshll.u32 %s116_s0, 4  ;;  %s98_s9 = smov [#allocation2]   ;;  %s14_s8 = int_to_ptr.hbm [resolvable:$true] %s13_s8 }
   0x2   :  { %s15_s10 = sshll.u32 %s98_s9, 4  ;;  %s16_s10 = int_to_ptr.vmem [resolvable:$true] %s15_s10 }
   0x3   :  { %18 = dma.hbm_to_vmem [thread:$0]  %s14_s8, 256, %s16_s10, [#allocation3]  }
   0x4   :  { %94 = dma.done.wait [#allocation3], 256  }
   0x5   :  { %95 = vsyncadd [#allocation3], 4294967040  ;;  %s99_s11 = smov [#allocation5]   ;;  %s34_s15 = sshll.u32 %s117_s1, 4  ;;  %v23_v0 = vld [vmem:[#allocation2] sm:$0xff]  ;;  %v24_v1 = vld [vmem:[#allocation2 + $0x8] sm:$0xff]  ;;  %s35_s15 = int_to_ptr.hbm [resolvable:$true] %s34_s15 }
   0x6   :  { %s32_s12 = sshll.u32 %s99_s11, 4  ;;  %25 = vst [vmem:[#allocation5] sm:$0xff] %v23_v0  ;;  %s33_s12 = int_to_ptr.vmem [resolvable:$true] %s32_s12 }
   0x7   :  { %26 = vst [vmem:[#allocation5 + $0x8] sm:$0xff] %v24_v1 }
   0x8   :  { %37 = dma.vmem_to_hbm [thread:$0]  %s33_s12, 256, %s35_s15, [#allocation4]  }
   0x9   :  { %96 = dma.done.wait [#allocation4], 256  }
   0xa   :  { %97 = vsyncadd [#allocation4], 4294967040 }
   0xb   :  { %42 = vsyncpa [#allocation3], 1 }
   0xc   :  { %43 = vsyncpa [#allocation4], 1 }

</bundles_post_ra>
